<compile_context>
chip_gen: v7x
topology: tpu7x:2x2x1
jax: 0.10.0
libtpu: 0.0.40
codegen_flags: <defaults>
</compile_context>

<pallas_src>
import math

import jax
import jax.numpy as jnp
from jax.experimental import pallas as pl
from jax.experimental.pallas import tpu as pltpu

_LANE = 128  # lane-dense padded width of the fused Q-head output


# ----------------------------- math helpers -----------------------------------

def _layernorm(h, gamma, beta, eps=1e-5):
    mu = jnp.mean(h, axis=-1, keepdims=True)
    var = jnp.mean((h - mu) ** 2, axis=-1, keepdims=True)
    return (h - mu) * jax.lax.rsqrt(var + eps) * gamma + beta


def _gelu_exact(h):
    # torch.nn.GELU() default = exact erf formulation
    return 0.5 * h * (1.0 + jax.lax.erf(h * (1.0 / math.sqrt(2.0))))


# ----------------------------- Pallas kernel ----------------------------------

def critic_kernel(obs_ref, act_ref,
                  w1o_ref, w1a_ref, vec_ref,
                  w2_ref, wq_ref, bq_ref,
                  q_ref):
    # packed per-feature vectors: rows = [b1, ln1_g, ln1_b, b2, ln2_g, ln2_b, 0, 0]
    vec = vec_ref[...]                                   # (8, H) f32
    b1, g1, be1 = vec[0:1], vec[1:2], vec[2:3]
    b2, g2, be2 = vec[3:4], vec[4:5], vec[5:6]

    obs = obs_ref[...].astype(jnp.bfloat16)              # (TB, obs_dim)
    act = act_ref[...].astype(jnp.bfloat16)              # (TB, act_dim)

    # encoder layer 1: (split) Linear + LayerNorm + GELU   (f32 accumulation)
    h = (jnp.dot(obs, w1o_ref[...], preferred_element_type=jnp.float32)
         + jnp.dot(act, w1a_ref[...], preferred_element_type=jnp.float32)
         + b1)
    h = _gelu_exact(_layernorm(h, g1, be1))

    # encoder layer 2: Linear + LayerNorm + GELU
    h = jnp.dot(h.astype(jnp.bfloat16), w2_ref[...],
                preferred_element_type=jnp.float32) + b2
    h = _gelu_exact(_layernorm(h, g2, be2))

    # fused dual Q heads, zero-padded to 128 lanes: (TB, H) @ (H, 128) + (1, 128)
    q_ref[...] = jnp.dot(h.astype(jnp.bfloat16), wq_ref[...],
                         preferred_element_type=jnp.float32) + bq_ref[...]


# ------------------------------ wrapper ----------------------------------------

def _round_up(x, m):
    return (x + m - 1) // m * m


def pack_params(params, obs_dim):
    """Convert canonical f32 params into kernel-ready arrays (bf16 weights,
    split w1, lane-padded Q heads, packed (8,H) vector block)."""
    H = params["w1"].shape[1]
    n_q = params["wq"].shape[1]

    wq_pad = jnp.zeros((H, _LANE), jnp.float32).at[:, :n_q].set(params["wq"])
    bq_pad = jnp.zeros((1, _LANE), jnp.float32).at[:, :n_q].set(params["bq"])

    vec = jnp.zeros((8, H), jnp.float32)
    vec = vec.at[0].set(params["b1"][0]).at[1].set(params["ln1_g"][0]).at[2].set(params["ln1_b"][0])
    vec = vec.at[3].set(params["b2"][0]).at[4].set(params["ln2_g"][0]).at[5].set(params["ln2_b"][0])

    return {
        "w1_obs": params["w1"][:obs_dim].astype(jnp.bfloat16),   # (obs_dim, H)
        "w1_act": params["w1"][obs_dim:].astype(jnp.bfloat16),   # (act_dim, H)
        "w2": params["w2"].astype(jnp.bfloat16),                 # (H, H)
        "wq": wq_pad.astype(jnp.bfloat16),                       # (H, 128)
        "bq": bq_pad,                                            # (1, 128) f32
        "vec": vec,                                              # (8, H)  f32
    }


def critic_forward(kparams, obs, action, *, max_tile_b=512):
    """Returns (q1, q2), each [B, 1] float32."""
    obs = obs.astype(jnp.float32)
    action = action.astype(jnp.float32)
    B, obs_dim = obs.shape
    act_dim = action.shape[1]
    H = kparams["w2"].shape[0]

    # large batch tile (multiple of 8), pad batch to a tile multiple
    tile_b = min(max_tile_b, _round_up(B, 8))
    Bp = _round_up(B, tile_b)
    if Bp != B:
        pad = Bp - B
        obs = jnp.pad(obs, ((0, pad), (0, 0)))
        action = jnp.pad(action, ((0, pad), (0, 0)))
    n_tiles = Bp // tile_b

    full = lambda shape: pl.BlockSpec(shape, lambda i: tuple(0 for _ in shape))

    q = pl.pallas_call(
        critic_kernel,
        out_shape=jax.ShapeDtypeStruct((Bp, _LANE), jnp.float32),
        grid_spec=pltpu.PrefetchScalarGridSpec(
            num_scalar_prefetch=0,
            grid=(n_tiles,),
            in_specs=[
                pl.BlockSpec((tile_b, obs_dim), lambda i: (i, 0)),   # obs tile
                pl.BlockSpec((tile_b, act_dim), lambda i: (i, 0)),   # action tile
                full((obs_dim, H)),                                  # w1 (obs part)
                full((act_dim, H)),                                  # w1 (act part)
                full((8, H)),                                        # packed b/ln vectors
                full((H, H)),                                        # w2
                full((H, _LANE)),                                    # padded Q heads
                full((1, _LANE)),                                    # padded Q bias
            ],
            out_specs=pl.BlockSpec((tile_b, _LANE), lambda i: (i, 0)),
        ),
        compiler_params=pltpu.CompilerParams(dimension_semantics=("parallel",)),
    )(obs, action,
      kparams["w1_obs"], kparams["w1_act"], kparams["vec"],
      kparams["w2"], kparams["wq"], kparams["bq"])

    q = q[:B]
    return q[:, 0:1], q[:, 1:2]


# --------------------------- parameter init -------------------------------------

def _orthogonal(key, shape, gain):
    rows, cols = shape
    a = jax.random.normal(key, (max(rows, cols), min(rows, cols)), jnp.float32)
    q, r = jnp.linalg.qr(a)
    q = q * jnp.sign(jnp.diagonal(r))
    if rows < cols:
        q = q.T
    return gain * q[:rows, :cols]


def init_params(key, obs_dim, act_dim, hidden):
    D = obs_dim + act_dim
    k1, k2, k3, k4 = jax.random.split(key, 4)
    w1 = _orthogonal(k1, (hidden, D), gain=math.sqrt(2.0))       # torch layout (out, in)
    w2 = _orthogonal(k2, (hidden, hidden), gain=math.sqrt(2.0))
    wq1 = _orthogonal(k3, (1, hidden), gain=0.01)
    wq2 = _orthogonal(k4, (1, hidden), gain=0.01)
    return {
        "w1": w1.T,                                 # (D, H)
        "b1": jnp.zeros((1, hidden), jnp.float32),
        "ln1_g": jnp.ones((1, hidden), jnp.float32),
        "ln1_b": jnp.zeros((1, hidden), jnp.float32),
        "w2": w2.T,                                 # (H, H)
        "b2": jnp.zeros((1, hidden), jnp.float32),
        "ln2_g": jnp.ones((1, hidden), jnp.float32),
        "ln2_b": jnp.zeros((1, hidden), jnp.float32),
        "wq": jnp.concatenate([wq1.T, wq2.T], axis=1),  # (H, 2) = [Q1 | Q2]
        "bq": jnp.zeros((1, 2), jnp.float32),
    }


# ----------------------------- references ---------------------------------------

def critic_reference_f32(params, obs, action):
    x = jnp.concatenate([obs, action], axis=-1).astype(jnp.float32)
    h = x @ params["w1"] + params["b1"]
    h = _gelu_exact(_layernorm(h, params["ln1_g"], params["ln1_b"]))
    h = h @ params["w2"] + params["b2"]
    h = _gelu_exact(_layernorm(h, params["ln2_g"], params["ln2_b"]))
    q = h @ params["wq"] + params["bq"]
    return q[:, 0:1], q[:, 1:2]


def critic_reference_mixed(params, obs, action):
    """Mirrors the kernel's precision strategy: bf16 MXU operands, f32 elsewhere."""
    def mm(a, w):
        return jnp.dot(a.astype(jnp.bfloat16), w.astype(jnp.bfloat16),
                       preferred_element_type=jnp.float32)
    od = obs.shape[1]
    h = mm(obs, params["w1"][:od]) + mm(action, params["w1"][od:]) + params["b1"]
    h = _gelu_exact(_layernorm(h, params["ln1_g"], params["ln1_b"]))
    h = mm(h, params["w2"]) + params["b2"]
    h = _gelu_exact(_layernorm(h, params["ln2_g"], params["ln2_b"]))
    q = mm(h, params["wq"]) + params["bq"]
    return q[:, 0:1], q[:, 1:2]


# --------------------------------- main ------------------------------------------

if __name__ == "__main__":
    obs_dim, act_dim, hidden = 24, 8, 128

    key = jax.random.PRNGKey(0)
    kp, ko, ka = jax.random.split(key, 3)
    params = init_params(kp, obs_dim, act_dim, hidden)
    kparams = pack_params(params, obs_dim)

    def check(batch, max_tile_b):
        ko_b, ka_b = jax.random.split(jax.random.fold_in(key, batch), 2)
        obs = jax.random.normal(ko_b, (batch, obs_dim), jnp.float32)
        action = jax.random.normal(ka_b, (batch, act_dim), jnp.float32)

        q1, q2 = critic_forward(kparams, obs, action, max_tile_b=max_tile_b)
        q1 = jax.block_until_ready(q1)
        q2 = jax.block_until_ready(q2)
        assert q1.shape == (batch, 1) and q2.shape == (batch, 1)

        # tight check vs. a reference that mirrors the kernel's mixed precision
        m1, m2 = critic_reference_mixed(params, obs, action)
        assert jnp.allclose(q1, m1, atol=5e-3, rtol=5e-3), "Q1 mismatch (mixed ref)"
        assert jnp.allclose(q2, m2, atol=5e-3, rtol=5e-3), "Q2 mismatch (mixed ref)"

        # loose check vs. pure-f32 torch-equivalent math (bf16 MXU rounding allowed)
        r1, r2 = critic_reference_f32(params, obs, action)
        assert jnp.allclose(q1, r1, atol=5e-2, rtol=5e-2), "Q1 mismatch (f32 ref)"
        assert jnp.allclose(q2, r2, atol=5e-2, rtol=5e-2), "Q2 mismatch (f32 ref)"

    check(batch=10, max_tile_b=512)   # single-tile path + batch padding (10 -> 16)
    check(batch=40, max_tile_b=16)    # multi-step grid path (3 tiles of 16)

    print("KERNEL_OK")
</pallas_src>

<mosaic_0001>
module attributes {stable_mosaic.version = 11 : i64} {
  func.func @critic_kernel(%arg0: i32, %arg1: memref<16x24xf32, #tpu.memory_space<vmem>>, %arg2: memref<16x8xf32, #tpu.memory_space<vmem>>, %arg3: memref<24x128xbf16, #tpu.memory_space<vmem>>, %arg4: memref<8x128xbf16, #tpu.memory_space<vmem>>, %arg5: memref<8x128xf32, #tpu.memory_space<vmem>>, %arg6: memref<128x128xbf16, #tpu.memory_space<vmem>>, %arg7: memref<128x128xbf16, #tpu.memory_space<vmem>>, %arg8: memref<1x128xf32, #tpu.memory_space<vmem>>, %arg9: memref<16x128xf32, #tpu.memory_space<vmem>>) attributes {dimension_semantics = [#tpu.dimension_semantics<parallel>], iteration_bounds = array<i64: 1>, scalar_prefetch = 0 : i64, scratch_operands = 0 : i64, tpu.core_type = #tpu.core_type<tc>, window_params = [{transform_indices = @transform_0, window_bounds = array<i64: 16, 24>}, {transform_indices = @transform_1, window_bounds = array<i64: 16, 8>}, {pipeline_mode = #tpu.pipeline_mode<synchronous>, transform_indices = @transform_2, window_bounds = array<i64: 24, 128>}, {pipeline_mode = #tpu.pipeline_mode<synchronous>, transform_indices = @transform_3, window_bounds = array<i64: 8, 128>}, {pipeline_mode = #tpu.pipeline_mode<synchronous>, transform_indices = @transform_4, window_bounds = array<i64: 8, 128>}, {pipeline_mode = #tpu.pipeline_mode<synchronous>, transform_indices = @transform_5, window_bounds = array<i64: 128, 128>}, {pipeline_mode = #tpu.pipeline_mode<synchronous>, transform_indices = @transform_6, window_bounds = array<i64: 128, 128>}, {pipeline_mode = #tpu.pipeline_mode<synchronous>, transform_indices = @transform_7, window_bounds = array<i64: 1, 128>}, {transform_indices = @transform_8, window_bounds = array<i64: 16, 128>}]} {
    %c0 = arith.constant 0 : index
    %c0_0 = arith.constant 0 : index
    %0 = vector.load %arg5[%c0, %c0_0] : memref<8x128xf32, #tpu.memory_space<vmem>>, vector<8x128xf32>
    %1 = vector.extract_strided_slice %0 {offsets = [0, 0], sizes = [1, 128], strides = [1, 1]} : vector<8x128xf32> to vector<1x128xf32>
    %2 = vector.extract_strided_slice %0 {offsets = [1, 0], sizes = [1, 128], strides = [1, 1]} : vector<8x128xf32> to vector<1x128xf32>
    %3 = vector.extract_strided_slice %0 {offsets = [2, 0], sizes = [1, 128], strides = [1, 1]} : vector<8x128xf32> to vector<1x128xf32>
    %4 = vector.extract_strided_slice %0 {offsets = [3, 0], sizes = [1, 128], strides = [1, 1]} : vector<8x128xf32> to vector<1x128xf32>
    %5 = vector.extract_strided_slice %0 {offsets = [4, 0], sizes = [1, 128], strides = [1, 1]} : vector<8x128xf32> to vector<1x128xf32>
    %6 = vector.extract_strided_slice %0 {offsets = [5, 0], sizes = [1, 128], strides = [1, 1]} : vector<8x128xf32> to vector<1x128xf32>
    %c0_1 = arith.constant 0 : index
    %c0_2 = arith.constant 0 : index
    %7 = vector.load %arg1[%c0_1, %c0_2] : memref<16x24xf32, #tpu.memory_space<vmem>>, vector<16x24xf32>
    %8 = arith.truncf %7 : vector<16x24xf32> to vector<16x24xbf16>
    %c0_3 = arith.constant 0 : index
    %c0_4 = arith.constant 0 : index
    %9 = vector.load %arg2[%c0_3, %c0_4] : memref<16x8xf32, #tpu.memory_space<vmem>>, vector<16x8xf32>
    %10 = arith.truncf %9 : vector<16x8xf32> to vector<16x8xbf16>
    %c0_5 = arith.constant 0 : index
    %c0_6 = arith.constant 0 : index
    %11 = vector.load %arg3[%c0_5, %c0_6] : memref<24x128xbf16, #tpu.memory_space<vmem>>, vector<24x128xbf16>
    %cst = arith.constant dense<0.000000e+00> : vector<16x128xf32>
    %12 = tpu.matmul %8, %11, %cst {dimension_numbers = #tpu.dot_dimension_numbers<[1], [0], [0], [1], [0, 0, 1, 1], [], []>} : vector<16x24xbf16>, vector<24x128xbf16>, vector<16x128xf32> -> vector<16x128xf32>
    %c0_7 = arith.constant 0 : index
    %c0_8 = arith.constant 0 : index
    %13 = vector.load %arg4[%c0_7, %c0_8] : memref<8x128xbf16, #tpu.memory_space<vmem>>, vector<8x128xbf16>
    %cst_9 = arith.constant dense<0.000000e+00> : vector<16x128xf32>
    %14 = tpu.matmul %10, %13, %cst_9 {dimension_numbers = #tpu.dot_dimension_numbers<[1], [0], [0], [1], [0, 0, 1, 1], [], []>} : vector<16x8xbf16>, vector<8x128xbf16>, vector<16x128xf32> -> vector<16x128xf32>
    %15 = arith.addf %12, %14 : vector<16x128xf32>
    %16 = vector.broadcast %1 : vector<1x128xf32> to vector<16x128xf32>
    %17 = arith.addf %15, %16 : vector<16x128xf32>
    %cst_10 = arith.constant dense<0.000000e+00> : vector<16xf32>
    %18 = vector.multi_reduction <add>, %17, %cst_10 [1] : vector<16x128xf32> to vector<16xf32>
    %19 = vector.shape_cast %18 : vector<16xf32> to vector<16x1xf32>
    %cst_11 = arith.constant 1.280000e+02 : f32
    %20 = vector.broadcast %cst_11 : f32 to vector<16x1xf32>
    %21 = arith.divf %19, %20 : vector<16x1xf32>
    %22 = vector.broadcast %21 : vector<16x1xf32> to vector<16x128xf32>
    %23 = arith.subf %17, %22 : vector<16x128xf32>
    %24 = arith.mulf %23, %23 : vector<16x128xf32>
    %cst_12 = arith.constant dense<0.000000e+00> : vector<16xf32>
    %25 = vector.multi_reduction <add>, %24, %cst_12 [1] : vector<16x128xf32> to vector<16xf32>
    %26 = vector.shape_cast %25 : vector<16xf32> to vector<16x1xf32>
    %cst_13 = arith.constant 1.280000e+02 : f32
    %27 = vector.broadcast %cst_13 : f32 to vector<16x1xf32>
    %28 = arith.divf %26, %27 : vector<16x1xf32>
    %29 = vector.broadcast %21 : vector<16x1xf32> to vector<16x128xf32>
    %30 = arith.subf %17, %29 : vector<16x128xf32>
    %cst_14 = arith.constant 9.99999974E-6 : f32
    %31 = vector.broadcast %cst_14 : f32 to vector<16x1xf32>
    %32 = arith.addf %28, %31 : vector<16x1xf32>
    %33 = math.rsqrt %32 : vector<16x1xf32>
    %34 = vector.broadcast %33 : vector<16x1xf32> to vector<16x128xf32>
    %35 = arith.mulf %30, %34 : vector<16x128xf32>
    %36 = vector.broadcast %2 : vector<1x128xf32> to vector<16x128xf32>
    %37 = arith.mulf %35, %36 : vector<16x128xf32>
    %38 = vector.broadcast %3 : vector<1x128xf32> to vector<16x128xf32>
    %39 = arith.addf %37, %38 : vector<16x128xf32>
    %cst_15 = arith.constant 5.000000e-01 : f32
    %40 = vector.broadcast %cst_15 : f32 to vector<16x128xf32>
    %41 = arith.mulf %40, %39 : vector<16x128xf32>
    %cst_16 = arith.constant 0.707106769 : f32
    %42 = vector.broadcast %cst_16 : f32 to vector<16x128xf32>
    %43 = arith.mulf %39, %42 : vector<16x128xf32>
    %44 = math.erf %43 : vector<16x128xf32>
    %cst_17 = arith.constant 1.000000e+00 : f32
    %45 = vector.broadcast %cst_17 : f32 to vector<16x128xf32>
    %46 = arith.addf %45, %44 : vector<16x128xf32>
    %47 = arith.mulf %41, %46 : vector<16x128xf32>
    %48 = arith.truncf %47 : vector<16x128xf32> to vector<16x128xbf16>
    %c0_18 = arith.constant 0 : index
    %c0_19 = arith.constant 0 : index
    %49 = vector.load %arg6[%c0_18, %c0_19] : memref<128x128xbf16, #tpu.memory_space<vmem>>, vector<128x128xbf16>
    %cst_20 = arith.constant dense<0.000000e+00> : vector<16x128xf32>
    %50 = tpu.matmul %48, %49, %cst_20 {dimension_numbers = #tpu.dot_dimension_numbers<[1], [0], [0], [1], [0, 0, 1, 1], [], []>} : vector<16x128xbf16>, vector<128x128xbf16>, vector<16x128xf32> -> vector<16x128xf32>
    %51 = vector.broadcast %4 : vector<1x128xf32> to vector<16x128xf32>
    %52 = arith.addf %50, %51 : vector<16x128xf32>
    %cst_21 = arith.constant dense<0.000000e+00> : vector<16xf32>
    %53 = vector.multi_reduction <add>, %52, %cst_21 [1] : vector<16x128xf32> to vector<16xf32>
    %54 = vector.shape_cast %53 : vector<16xf32> to vector<16x1xf32>
    %cst_22 = arith.constant 1.280000e+02 : f32
    %55 = vector.broadcast %cst_22 : f32 to vector<16x1xf32>
    %56 = arith.divf %54, %55 : vector<16x1xf32>
    %57 = vector.broadcast %56 : vector<16x1xf32> to vector<16x128xf32>
    %58 = arith.subf %52, %57 : vector<16x128xf32>
    %59 = arith.mulf %58, %58 : vector<16x128xf32>
    %cst_23 = arith.constant dense<0.000000e+00> : vector<16xf32>
    %60 = vector.multi_reduction <add>, %59, %cst_23 [1] : vector<16x128xf32> to vector<16xf32>
    %61 = vector.shape_cast %60 : vector<16xf32> to vector<16x1xf32>
    %cst_24 = arith.constant 1.280000e+02 : f32
    %62 = vector.broadcast %cst_24 : f32 to vector<16x1xf32>
    %63 = arith.divf %61, %62 : vector<16x1xf32>
    %64 = vector.broadcast %56 : vector<16x1xf32> to vector<16x128xf32>
    %65 = arith.subf %52, %64 : vector<16x128xf32>
    %cst_25 = arith.constant 9.99999974E-6 : f32
    %66 = vector.broadcast %cst_25 : f32 to vector<16x1xf32>
    %67 = arith.addf %63, %66 : vector<16x1xf32>
    %68 = math.rsqrt %67 : vector<16x1xf32>
    %69 = vector.broadcast %68 : vector<16x1xf32> to vector<16x128xf32>
    %70 = arith.mulf %65, %69 : vector<16x128xf32>
    %71 = vector.broadcast %5 : vector<1x128xf32> to vector<16x128xf32>
    %72 = arith.mulf %70, %71 : vector<16x128xf32>
    %73 = vector.broadcast %6 : vector<1x128xf32> to vector<16x128xf32>
    %74 = arith.addf %72, %73 : vector<16x128xf32>
    %cst_26 = arith.constant 5.000000e-01 : f32
    %75 = vector.broadcast %cst_26 : f32 to vector<16x128xf32>
    %76 = arith.mulf %75, %74 : vector<16x128xf32>
    %cst_27 = arith.constant 0.707106769 : f32
    %77 = vector.broadcast %cst_27 : f32 to vector<16x128xf32>
    %78 = arith.mulf %74, %77 : vector<16x128xf32>
    %79 = math.erf %78 : vector<16x128xf32>
    %cst_28 = arith.constant 1.000000e+00 : f32
    %80 = vector.broadcast %cst_28 : f32 to vector<16x128xf32>
    %81 = arith.addf %80, %79 : vector<16x128xf32>
    %82 = arith.mulf %76, %81 : vector<16x128xf32>
    %83 = arith.truncf %82 : vector<16x128xf32> to vector<16x128xbf16>
    %c0_29 = arith.constant 0 : index
    %c0_30 = arith.constant 0 : index
    %84 = vector.load %arg7[%c0_29, %c0_30] : memref<128x128xbf16, #tpu.memory_space<vmem>>, vector<128x128xbf16>
    %cst_31 = arith.constant dense<0.000000e+00> : vector<16x128xf32>
    %85 = tpu.matmul %83, %84, %cst_31 {dimension_numbers = #tpu.dot_dimension_numbers<[1], [0], [0], [1], [0, 0, 1, 1], [], []>} : vector<16x128xbf16>, vector<128x128xbf16>, vector<16x128xf32> -> vector<16x128xf32>
    %c0_32 = arith.constant 0 : index
    %c0_33 = arith.constant 0 : index
    %86 = vector.load %arg8[%c0_32, %c0_33] : memref<1x128xf32, #tpu.memory_space<vmem>>, vector<1x128xf32>
    %87 = vector.broadcast %86 : vector<1x128xf32> to vector<16x128xf32>
    %88 = arith.addf %85, %87 : vector<16x128xf32>
    %c0_34 = arith.constant 0 : index
    %c0_35 = arith.constant 0 : index
    %89 = vector.load %arg9[%c0_34, %c0_35] : memref<16x128xf32, #tpu.memory_space<vmem>>, vector<16x128xf32>
    tpu.vector_store %arg9[%c0_34, %c0_35], %88 {strides = array<i32>} : memref<16x128xf32, #tpu.memory_space<vmem>>, vector<16x128xf32>,
    return
  }
  func.func @transform_0(%arg0: i32) -> (i32, i32) {
    %c0_i32 = arith.constant 0 : i32
    %c0_i32_0 = arith.constant 0 : i32
    return %arg0, %c0_i32 : i32, i32
  }
  func.func @transform_1(%arg0: i32) -> (i32, i32) {
    %c0_i32 = arith.constant 0 : i32
    %c0_i32_0 = arith.constant 0 : i32
    return %arg0, %c0_i32 : i32, i32
  }
  func.func @transform_2(%arg0: i32) -> (i32, i32) {
    %c0_i32 = arith.constant 0 : i32
    %c0_i32_0 = arith.constant 0 : i32
    %c0_i32_1 = arith.constant 0 : i32
    return %c0_i32, %c0_i32_0 : i32, i32
  }
  func.func @transform_3(%arg0: i32) -> (i32, i32) {
    %c0_i32 = arith.constant 0 : i32
    %c0_i32_0 = arith.constant 0 : i32
    %c0_i32_1 = arith.constant 0 : i32
    return %c0_i32, %c0_i32_0 : i32, i32
  }
  func.func @transform_4(%arg0: i32) -> (i32, i32) {
    %c0_i32 = arith.constant 0 : i32
    %c0_i32_0 = arith.constant 0 : i32
    %c0_i32_1 = arith.constant 0 : i32
    return %c0_i32, %c0_i32_0 : i32, i32
  }
  func.func @transform_5(%arg0: i32) -> (i32, i32) {
    %c0_i32 = arith.constant 0 : i32
    %c0_i32_0 = arith.constant 0 : i32
    %c0_i32_1 = arith.constant 0 : i32
    return %c0_i32, %c0_i32_0 : i32, i32
  }
  func.func @transform_6(%arg0: i32) -> (i32, i32) {
    %c0_i32 = arith.constant 0 : i32
    %c0_i32_0 = arith.constant 0 : i32
    %c0_i32_1 = arith.constant 0 : i32
    return %c0_i32, %c0_i32_0 : i32, i32
  }
  func.func @transform_7(%arg0: i32) -> (i32, i32) {
    %c0_i32 = arith.constant 0 : i32
    %c0_i32_0 = arith.constant 0 : i32
    %c0_i32_1 = arith.constant 0 : i32
    return %c0_i32, %c0_i32_0 : i32, i32
  }
  func.func @transform_8(%arg0: i32) -> (i32, i32) {
    %c0_i32 = arith.constant 0 : i32
    %c0_i32_0 = arith.constant 0 : i32
    return %arg0, %c0_i32 : i32, i32
  }
}

</mosaic_0001>

<bundles_post_ra>
// kernel: tpu_custom_call.1
= control target key start
LH: loop header
LB: loop body
LE: loop exit
PB: predicated region body
PF: predicated region fallthrough
CT: control target
= control target key end

     0   :  { %13 = vsyncpa [#allocation3], 0  ;;  %s937_s0 = inlined_call_operand.vmem [shape: f32[16,24], index: 0, kind: input, shape index: {}]   ;;  %s938_s1 = inlined_call_operand.vmem [shape: f32[16,8], index: 1, kind: input, shape index: {}]   ;;  %s939_s2 = inlined_call_operand.vmem [shape: bf16[24,128], index: 2, kind: input, shape index: {}]   ;;  %s940_s3 = inlined_call_operand.hbm [shape: bf16[8,128], index: 3, kind: input, shape index: {}]   ;;  %s941_s4 = inlined_call_operand.vmem [shape: f32[8,128], index: 4, kind: input, shape index: {}]   ;;  %s942_s5 = inlined_call_operand.hbm [shape: bf16[128,128], index: 5, kind: input, shape index: {}]   ;;  %s943_s6 = inlined_call_operand.hbm [shape: bf16[128,128], index: 6, kind: input, shape index: {}]   ;;  %s944_s7 = inlined_call_operand.vmem [shape: f32[1,128], index: 7, kind: input, shape index: {}]   ;;  %s945_s8 = inlined_call_operand.hbm [shape: f32[16,128], index: 8, kind: output, shape index: {}]  }
   0x1   :  { %14 = vsyncpa [#allocation6], 0 }
   0x2   :  { %15 = vsyncpa [#allocation4], 0  ;;  %s761_s27 = smov [#allocation5]   ;;  %s667_s9 = scalar_lea.hbm %s942_s5, 1024 }
   0x3   :  { %s39_s28 = sshll.u32 %s761_s27, 4  ;;  %p668_p0 = scmp.ne.s32.totalorder %s942_s5, %s667_s9  ;;  %s40_s28 = int_to_ptr.vmem [resolvable:$true] %s39_s28 }
   0x4   :  { %p671_p1 = scmp.lt.u32.totalorder %s667_s9, %s942_s5 }
   0x6   :  { %p673_p2 = pnand %p671_p1, %p668_p0 }
   0x8   :  { %676 = shalt.err (!%p673_p2)
}
   0x9   :  { %s677_s14 = scalar_lea.vmem %s40_s28, 1024  ;;  %p682_p4 = scmp.lt.s32.totalorder %s40_s28, %s40_s28 }
   0xa   :  { %p678_p3 = scmp.ne.s32.totalorder %s40_s28, %s677_s14  ;;  %p683_p5 = scmp.lt.s32.totalorder %s677_s14, %s677_s14 }
   0xc   :  { %p684_p6 = por %p683_p5, %p682_p4 }
   0xe   :  { %p685_p7 = pnand %p684_p6, %p678_p3 }
  0x10   :  { %688 = shalt.err (!%p685_p7)
}
  0x11   :  { %s762_s15 = smov 64   ;;  %s763_s16 = smov 4  }
  0x12   :  { %45 = dma.hbm_to_vmem [thread:$0]  %s942_s5, 1024, %s40_s28, [#allocation6], %s762_s15, %s762_s15, %s763_s16  }
  0x13   :  { %s764_s19 = smov [#allocation2]   ;;  %s765_s21 = smov [#allocation7]  }
  0x14   :  { %s28_s20 = sshll.u32 %s764_s19, 4  ;;  %s51_s22 = sshll.u32 %s765_s21, 4  ;;  %s29_s20 = int_to_ptr.vmem [resolvable:$true] %s28_s20  ;;  %s52_s22 = int_to_ptr.vmem [resolvable:$true] %s51_s22 }
  0x15   :  { %s689_s25 = scalar_lea.hbm %s940_s3, 64 }
  0x16   :  { %p690_p8 = scmp.ne.s32.totalorder %s940_s3, %s689_s25  ;;  %p693_p9 = scmp.lt.u32.totalorder %s689_s25, %s940_s3 }
  0x18   :  { %p695_p10 = pnand %p693_p9, %p690_p8 }
  0x1a   :  { %698 = shalt.err (!%p695_p10)
}
  0x1b   :  { %s699_s5 = scalar_lea.vmem %s29_s20, 64  ;;  %p704_p12 = scmp.lt.s32.totalorder %s29_s20, %s29_s20 }
  0x1c   :  { %p700_p11 = scmp.ne.s32.totalorder %s29_s20, %s699_s5  ;;  %p705_p13 = scmp.lt.s32.totalorder %s699_s5, %s699_s5 }
  0x1e   :  { %p706_p0 = por %p705_p13, %p704_p12 }
  0x20   :  { %p707_p1 = pnand %p706_p0, %p700_p11 }
  0x22   :  { %710 = shalt.err (!%p707_p1)
}
  0x23   :  { %31 = dma.hbm_to_vmem [thread:$0]  %s940_s3, 64, %s29_s20, [#allocation3]  }
  0x24   :  { %s711_s12 = scalar_lea.hbm %s943_s6, 1024 }
  0x25   :  { %p712_p2 = scmp.ne.s32.totalorder %s943_s6, %s711_s12  ;;  %p715_p3 = scmp.lt.u32.totalorder %s711_s12, %s943_s6 }
  0x27   :  { %p717_p4 = pnand %p715_p3, %p712_p2 }
  0x29   :  { %720 = shalt.err (!%p717_p4)
}
  0x2a   :  { %s721_s19 = scalar_lea.vmem %s52_s22, 1024  ;;  %p726_p6 = scmp.lt.s32.totalorder %s52_s22, %s52_s22 }
  0x2b   :  { %p722_p5 = scmp.ne.s32.totalorder %s52_s22, %s721_s19  ;;  %p727_p7 = scmp.lt.s32.totalorder %s721_s19, %s721_s19 }
  0x2d   :  { %p728_p8 = por %p727_p7, %p726_p6 }
  0x2f   :  { %p729_p9 = pnand %p728_p8, %p722_p5 }
  0x31   :  { %732 = shalt.err (!%p729_p9)
}
  0x32   :  { %57 = dma.hbm_to_vmem [thread:$0]  %s943_s6, 1024, %s52_s22, [#allocation6], %s762_s15, %s762_s15, %s763_s16  }
  0x33   :  { %755 = dma.done.wait [#allocation3], 64  }
  0x34   :  { %756 = vsyncadd [#allocation3], 4294967232 }
  0x35   :  { %757 = dma.done.wait [#allocation6], 2048  }
  0x36   :  { %758 = vsyncadd [#allocation6], 4294965248  ;;  %v766_v0 = vmov 0.0   ;;  %vm767_vm0 = vmmov 0   ;;  %vm85_vm1 = vcmask 1043456   ;;  %v633_v1 = vld [vmem:[%s939_s2] sm:$0xff]   ;;  %v187_v12 = vlaneseq }
  0x37   :  { %575 = vmatprep.subr.bf16.mxu1 %v766_v0  ;;  %569 = vmatprep.subr.bf16.mxu0 %v766_v0  ;;  %v80_v2 = vld [vmem:[#allocation2] sm:$0xf]  ;;  %v75_v4 = vld [vmem:[%s938_s1 + $0x8] sm:$0xff]  ;;  %vm81_vm2 = vcmask 64512   ;;  %vm139_vm3 = vcmask 195584   ;;  %v637_v39 = vld [vmem:[#allocation5 + $0x10] sm:$0xff]  }
  0x38   :  { %571 = vmatprep.mubr.msk.bf16.mxu0 %vm767_vm0, %v766_v0  ;;  %579 = vmatprep.mubr.msk.bf16.mxu1 %vm767_vm0, %v766_v0  ;;  %v74_v3 = vld [vmem:[%s938_s1] sm:$0xff]  ;;  %v87_v5 = vsel %vm85_vm1, %v80_v2, 0  ;;  %v634_v7 = vld [vmem:[%s939_s2 + $0x8] ss:$0 sps:$4 sm:$0xff]   ;;  %v889_v13 = vshrl.u32 %v187_v12, 7  ;;  %v636_v38 = vld [vmem:[#allocation5 + $0x8] sm:$0xff]  }
  0x39   :  { %576 = vmatpush3.bf16.msra.mxu1 %v633_v1  ;;  %v76_v6 = vpack.c.bf16 %v75_v4, %v74_v3  ;;  %v71_v8 = vld [vmem:[%s937_s0] sm:$0xff]  ;;  %570 = vmatpush3.bf16.msra.mxu0 %v87_v5  ;;  %v72_v9 = vld [vmem:[%s937_s0 + $0x8] sm:$0xff]  ;;  %v144_v10 = vsel %vm85_vm1, %v634_v7, 0  ;;  %v641_v43 = vld [vmem:[#allocation5 + $0x30] sm:$0xff]   ;;  %s768_s5 = smov [#allocation8]  }
  0x3a   :  { %577 = vmatprep.subr.bf16.mxu1 %v766_v0  ;;  %583 = vmatprep.subr.bf16.mxu0 %v766_v0  ;;  %v73_v11 = vpack.c.bf16 %v72_v9, %v71_v8  ;;  %v189_v14 = vsub.s32 0, %v889_v13  ;;  %v895_v15 = vld [vmem:[%s941_s4] sm:$0xff]  ;;  %v640_v42 = vld [vmem:[#allocation5 + $0x28] sm:$0xff]   ;;  %v218_v51 = vsub.s32 1, %v889_v13  ;;  %v224_v52 = vsub.s32 2, %v889_v13  ;;  %s512_s28 = sshll.u32 %s768_s5, 4  ;;  %s513_s28 = int_to_ptr.vmem [resolvable:$true] %s512_s28 }
  0x3b   :  { %v635_v37 = vld [vmem:[#allocation5] sm:$0xff]   ;;  %v638_v40 = vld [vmem:[#allocation5 + $0x18] sm:$0xff]   ;;  %s733_s9 = scalar_lea.vmem %s513_s28, 256  ;;  %p738_p11 = scmp.lt.s32.totalorder %s513_s28, %s513_s28 }
  0x3c   :  { %572 = vmatmul.mubr.msk.bf16.vlgmr.msra.gmra.mrb[0].mxu0 %vm81_vm2, %v76_v6  ;;  %v190_v19 = vrot.slane %v895_v15, %v189_v14  ;;  %v639_v41 = vld [vmem:[#allocation5 + $0x20] sm:$0xff]   ;;  %v642_v44 = vld [vmem:[#allocation5 + $0x38] sm:$0xff]   ;;  %v219_v53 = vrot.slane %v895_v15, %v218_v51  ;;  %v225_v56 = vrot.slane %v895_v15, %v224_v52  ;;  %p734_p10 = scmp.ne.s32.totalorder %s513_s28, %s733_s9  ;;  %p739_p12 = scmp.lt.s32.totalorder %s733_s9, %s733_s9 }
  0x3d   :  { %578 = vmatpush3.bf16.msra.mxu1 %v144_v10  ;;  %599 = vmatprep.mubr.msk.bf16.mxu0 %vm767_vm0, %v766_v0 }
  0x3e   :  { %603 = vmatprep.subr.bf16.mxu1 %v766_v0  ;;  %584 = vmatpush3.bf16.msra.mxu0 %v635_v37  ;;  %p740_p13 = por %p739_p12, %p738_p11 }
  0x3f   :  { %585 = vmatprep.subr.bf16.mxu0 %v766_v0 }
  0x40   :  { %580 = vmatmul.mubr.msk.bf16.vlgmr.msra.gmra.mrb[0].mxu1 %vm139_vm3, %v73_v11  ;;  %v257_v11 = vsub.s32 3, %v889_v13  ;;  %p741_p0 = pnand %p740_p13, %p734_p10 }
  0x41   :  { %619 = vmatprep.mubr.msk.bf16.mxu1 %vm767_vm0, %v766_v0 }
  0x42   :  { %586 = vmatpush3.bf16.msra.mxu0 %v636_v38  ;;  %v258_v12 = vrot.slane %v895_v15, %v257_v11 }
  0x43   :  { %587 = vmatprep.subr.bf16.mxu0 %v766_v0 }
  0x46   :  { %588 = vmatpush3.bf16.msra.mxu0 %v637_v39 }
  0x47   :  { %589 = vmatprep.subr.bf16.mxu0 %v766_v0 }
  0x4a   :  { %590 = vmatpush3.bf16.msra.mxu0 %v638_v40 }
  0x4b   :  { %591 = vmatprep.subr.bf16.mxu0 %v766_v0 }
  0x4e   :  { %592 = vmatpush3.bf16.msra.mxu0 %v639_v41 }
  0x4f   :  { %593 = vmatprep.subr.bf16.mxu0 %v766_v0 }
  0x52   :  { %594 = vmatpush3.bf16.msra.mxu0 %v640_v42 }
  0x53   :  { %595 = vmatprep.subr.bf16.mxu0 %v766_v0 }
  0x56   :  { %596 = vmatpush3.bf16.msra.mxu0 %v641_v43  ;;  %v372_v43 = vsub.s32 4, %v889_v13 }
  0x57   :  { %597 = vmatprep.subr.bf16.mxu0 %v766_v0 }
  0x5a   :  { %598 = vmatpush3.bf16.msra.mxu0 %v642_v44  ;;  %v378_v44 = vsub.s32 5, %v889_v13 }
 0x10f   :  { %v123_v16 = vpop.f32.mrb[0].mxu0 }
 0x110   :  { %v573_v17 = vpop.f32.mrb[1].mxu0 }
 0x111   :  { %v126_v18 = vpop.f32.mrb[2].mxu0 }
 0x112   :  { %v574_v20 = vpop.f32.mrb[3].mxu0 }
 0x113   :  { %v180_v21 = vpop.f32.mrb[0].mxu1 }
 0x114   :  { %v181_v22 = vadd.f32 %v180_v21, %v123_v16  ;;  %v581_v23 = vpop.f32.mrb[1].mxu1 }
 0x115   :  { %v183_v24 = vpop.f32.mrb[2].mxu1 }
 0x116   :  { %v184_v25 = vadd.f32 %v183_v24, %v126_v18  ;;  %v582_v26 = vpop.f32.mrb[3].mxu1  ;;  %v191_v27 = vadd.f32 %v190_v19, %v181_v22 }
 0x118   :  { %193 = vadd.xlane.f32.xlu0 %v191_v27  ;;  %v192_v28 = vadd.f32 %v190_v19, %v184_v25 }
 0x11c   :  { %195 = vadd.xlane.f32.xlu0 %v192_v28 }
 0x1a5   :  { %v194_v29 = vpop.xlane.xlu0 %193 }
 0x1a6   :  { %v198_v30 = vmul.f32 0.0078125, %v194_v29  ;;  %v643_v29 = vld [vmem:[#allocation7] sm:$0xff]  }
 0x1a7   :  { %604 = vmatpush3.bf16.msra.mxu1 %v643_v29 }
 0x1a8   :  { %v200_v31 = vsub.f32 %v191_v27, %v198_v30  ;;  %605 = vmatprep.subr.bf16.mxu1 %v766_v0  ;;  %v644_v30 = vld [vmem:[#allocation7 + $0x8] sm:$0xff]  }
 0x1a9   :  { %v196_v32 = vpop.xlane.xlu0 %195 }
 0x1aa   :  { %v199_v33 = vmul.f32 0.0078125, %v196_v32  ;;  %v202_v34 = vmul.f32 %v200_v31, %v200_v31  ;;  %v646_v32 = vld [vmem:[#allocation7 + $0x18] sm:$0xff]  }
 0x1ab   :  { %606 = vmatpush3.bf16.msra.mxu1 %v644_v30 }
 0x1ac   :  { %v201_v35 = vsub.f32 %v192_v28, %v199_v33  ;;  %204 = vadd.xlane.f32.xlu1 %v202_v34  ;;  %607 = vmatprep.subr.bf16.mxu1 %v766_v0  ;;  %v647_v33 = vld [vmem:[#allocation7 + $0x20] sm:$0xff]   ;;  %v648_v34 = vld [vmem:[#allocation7 + $0x28] sm:$0xff]  }
 0x1ae   :  { %v203_v36 = vmul.f32 %v201_v35, %v201_v35 }
 0x1b0   :  { %206 = vadd.xlane.f32.xlu1 %v203_v36  ;;  %v650_v36 = vld [vmem:[#allocation7 + $0x38] sm:$0xff]  }
 0x239   :  { %v205_v45 = vpop.xlane.xlu1 %204 }
 0x23a   :  { %v208_v46 = vmul.f32 0.0078125, %v205_v45  ;;  %v373_v45 = vrot.slane %v895_v15, %v372_v43 }
 0x23c   :  { %v210_v47 = vadd.f32 1e-05, %v208_v46 }
 0x23d   :  { %v207_v48 = vpop.xlane.xlu1 %206 }
 0x23e   :  { %651 = vrsqrt.f32 %v210_v47  ;;  %v209_v49 = vmul.f32 0.0078125, %v207_v48  ;;  %v379_v48 = vrot.slane %v895_v15, %v378_v44  ;;  %v537_v15 = vld [vmem:[%s944_s7] ss:$0 sm:$0xff] }
 0x240   :  { %v211_v50 = vadd.f32 1e-05, %v209_v49 }
 0x242   :  { %653 = vrsqrt.f32 %v211_v50 }
 0x248   :  { %v652_v54 = vpop.eup %651 }
 0x249   :  { %v214_v55 = vmul.f32 %v652_v54, %v200_v31  ;;  %v645_v31 = vld [vmem:[#allocation7 + $0x10] sm:$0xff]  }
 0x24a   :  { %608 = vmatpush3.bf16.msra.mxu1 %v645_v31 }
 0x24b   :  { %v220_v57 = vmul.f32 %v219_v53, %v214_v55  ;;  %609 = vmatprep.subr.bf16.mxu1 %v766_v0 }
 0x24c   :  { %v654_v58 = vpop.eup %653 }
 0x24d   :  { %v215_v59 = vmul.f32 %v654_v58, %v201_v35  ;;  %v226_v60 = vadd.f32 %v225_v56, %v220_v57  ;;  %v649_v35 = vld [vmem:[#allocation7 + $0x30] sm:$0xff]  }
 0x24e   :  { %610 = vmatpush3.bf16.msra.mxu1 %v646_v32 }
 0x24f   :  { %v221_v61 = vmul.f32 %v219_v53, %v215_v59  ;;  %v230_v62 = vmul.f32 0.70710677, %v226_v60  ;;  %v228_v5 = vmul.f32 0.5, %v226_v60  ;;  %611 = vmatprep.subr.bf16.mxu1 %v766_v0 }
 0x251   :  { %v227_v63 = vadd.f32 %v225_v56, %v221_v61  ;;  %655 = verf.f32 %v230_v62 }
 0x252   :  { %612 = vmatpush3.bf16.msra.mxu1 %v647_v33 }
 0x253   :  { %v231_v1 = vmul.f32 0.70710677, %v227_v63  ;;  %v229_v6 = vmul.f32 0.5, %v227_v63  ;;  %613 = vmatprep.subr.bf16.mxu1 %v766_v0 }
 0x255   :  { %657 = verf.f32 %v231_v1 }
 0x256   :  { %614 = vmatpush3.bf16.msra.mxu1 %v648_v34 }
 0x257   :  { %615 = vmatprep.subr.bf16.mxu1 %v766_v0 }
 0x25a   :  { %616 = vmatpush3.bf16.msra.mxu1 %v649_v35 }
 0x25b   :  { %v656_v2 = vpop.eup %655  ;;  %617 = vmatprep.subr.bf16.mxu1 %v766_v0 }
 0x25c   :  { %v234_v3 = vadd.f32 1.0, %v656_v2 }
 0x25e   :  { %v236_v8 = vmul.f32 %v234_v3, %v228_v5  ;;  %618 = vmatpush3.bf16.msra.mxu1 %v650_v36 }
 0x25f   :  { %v658_v4 = vpop.eup %657 }
 0x260   :  { %v235_v7 = vadd.f32 1.0, %v658_v4 }
 0x262   :  { %v237_v9 = vmul.f32 %v235_v7, %v229_v6 }
 0x264   :  { %v238_v10 = vpack.c.bf16 %v237_v9, %v236_v8 }
 0x266   :  { %600 = vmatmul.mubr.bf16.vlgmr.msra.gmra.mrb[4].mxu0 %v238_v10 }
 0x339   :  { %v341_v14 = vpop.f32.mrb[4].mxu0 }
 0x33a   :  { %v342_v16 = vadd.f32 %v341_v14, %v258_v12  ;;  %v601_v17 = vpop.f32.mrb[5].mxu0 }
 0x33b   :  { %v344_v18 = vpop.f32.mrb[6].mxu0 }
 0x33c   :  { %v345_v19 = vadd.f32 %v344_v18, %v258_v12  ;;  %348 = vadd.xlane.f32.xlu0 %v342_v16  ;;  %v602_v20 = vpop.f32.mrb[7].mxu0 }
 0x33e   :  { %350 = vadd.xlane.f32.xlu1 %v345_v19 }
 0x3c9   :  { %v349_v21 = vpop.xlane.xlu0 %348 }
 0x3ca   :  { %v352_v22 = vmul.f32 0.0078125, %v349_v21 }
 0x3cb   :  { %v351_v23 = vpop.xlane.xlu1 %350 }
 0x3cc   :  { %v354_v24 = vsub.f32 %v342_v16, %v352_v22  ;;  %v353_v25 = vmul.f32 0.0078125, %v351_v23 }
 0x3ce   :  { %v355_v26 = vsub.f32 %v345_v19, %v353_v25  ;;  %v356_v27 = vmul.f32 %v354_v24, %v354_v24 }
 0x3d0   :  { %358 = vadd.xlane.f32.xlu0 %v356_v27  ;;  %v357_v28 = vmul.f32 %v355_v26, %v355_v26 }
 0x3d2   :  { %360 = vadd.xlane.f32.xlu1 %v357_v28 }
 0x45d   :  { %v359_v37 = vpop.xlane.xlu0 %358 }
 0x45e   :  { %v362_v38 = vmul.f32 0.0078125, %v359_v37 }
 0x45f   :  { %v361_v39 = vpop.xlane.xlu1 %360 }
 0x460   :  { %v364_v40 = vadd.f32 1e-05, %v362_v38  ;;  %v363_v41 = vmul.f32 0.0078125, %v361_v39 }
 0x462   :  { %659 = vrsqrt.f32 %v364_v40  ;;  %v365_v42 = vadd.f32 1e-05, %v363_v41 }
 0x464   :  { %661 = vrsqrt.f32 %v365_v42 }
 0x46c   :  { %v660_v46 = vpop.eup %659 }
 0x46d   :  { %v368_v47 = vmul.f32 %v660_v46, %v354_v24 }
 0x46e   :  { %v662_v0 = vpop.eup %661 }
 0x46f   :  { %v374_v49 = vmul.f32 %v373_v45, %v368_v47  ;;  %v369_v50 = vmul.f32 %v662_v0, %v355_v26 }
 0x471   :  { %v375_v51 = vmul.f32 %v373_v45, %v369_v50  ;;  %v380_v52 = vadd.f32 %v379_v48, %v374_v49 }
 0x473   :  { %v381_v53 = vadd.f32 %v379_v48, %v375_v51  ;;  %v384_v54 = vmul.f32 0.70710677, %v380_v52  ;;  %v382_v13 = vmul.f32 0.5, %v380_v52 }
 0x475   :  { %v385_v55 = vmul.f32 0.70710677, %v381_v53  ;;  %663 = verf.f32 %v384_v54  ;;  %v383_v59 = vmul.f32 0.5, %v381_v53 }
 0x477   :  { %665 = verf.f32 %v385_v55 }
 0x47f   :  { %v664_v56 = vpop.eup %663 }
 0x480   :  { %v388_v57 = vadd.f32 1.0, %v664_v56 }
 0x481   :  { %v666_v58 = vpop.eup %665 }
 0x482   :  { %v389_v60 = vadd.f32 1.0, %v666_v58  ;;  %v390_v61 = vmul.f32 %v388_v57, %v382_v13 }
 0x484   :  { %v391_v62 = vmul.f32 %v389_v60, %v383_v59 }
 0x486   :  { %v392_v63 = vpack.c.bf16 %v391_v62, %v390_v61 }
 0x488   :  { %620 = vmatmul.mubr.bf16.vlgmr.msra.gmra.mrb[4].mxu1 %v392_v63 }
 0x55b   :  { %v498_v1 = vpop.f32.mrb[4].mxu1 }
 0x55c   :  { %v499_v2 = vadd.f32 %v537_v15, %v498_v1  ;;  %v621_v3 = vpop.f32.mrb[5].mxu1 }
 0x55d   :  { %v501_v4 = vpop.f32.mrb[6].mxu1 }
 0x55e   :  { %505 = vst [vmem:[#allocation8] sm:$0xff] %v499_v2  ;;  %v502_v5 = vadd.f32 %v537_v15, %v501_v4  ;;  %v622_v6 = vpop.f32.mrb[7].mxu1 }
 0x560   :  { %506 = vst [vmem:[#allocation8 + $0x8] sm:$0xff] %v502_v5 }
 0x561   :  { %744 = shalt.err (!%p741_p0)
}
 0x562   :  { %s745_s11 = scalar_lea.hbm %s945_s8, 256 }
 0x563   :  { %p746_p1 = scmp.ne.s32.totalorder %s945_s8, %s745_s11  ;;  %p749_p2 = scmp.lt.u32.totalorder %s745_s11, %s945_s8 }
 0x565   :  { %p751_p3 = pnand %p749_p2, %p746_p1 }
 0x567   :  { %754 = shalt.err (!%p751_p3)
}
 0x568   :  { %s769_s18 = smov 128   ;;  %s770_s19 = smov 8  }
 0x569   :  { %518 = dma.vmem_to_hbm [thread:$0]  %s513_s28, 256, %s945_s8, [#allocation4], %s769_s18, %s769_s18, %s770_s19  }
 0x56a   :  { %759 = dma.done.wait [#allocation4], 256  }
 0x56b   :  { %760 = vsyncadd [#allocation4], 4294967040 }
 0x56c   :  { %522 = vsyncpa [#allocation3], 1 }
 0x56d   :  { %523 = vsyncpa [#allocation6], 1 }
 0x56e   :  { %524 = vsyncpa [#allocation4], 1 }

</bundles_post_ra>
